<compile_context>
chip_gen: v7x
topology: tpu7x:2x2x1
jax: 0.10.0
libtpu: 0.0.40
codegen_flags: <defaults>
</compile_context>

<pallas_src>
import jax
import jax.numpy as jnp
from jax import lax
from jax.experimental import pallas as pl
from jax.experimental.pallas import tpu as pltpu

LANE = 128
SUBLANE = 8


def _rup(n, m):
    return ((n + m - 1) // m) * m


def _pad2d(x, rows, cols):
    return jnp.pad(x, ((0, rows - x.shape[0]), (0, cols - x.shape[1])))


# ---------------------------------------------------------------------------
# Kernel
# ---------------------------------------------------------------------------
def _make_kernel(cfg):
    K = cfg["kernel_size"]
    T = cfg["T"]
    M = cfg["M"]        # padded B*T rows
    Cp = cfg["Cp"]      # unified padded channel/lane width
    blocks = cfg["blocks"]

    def kernel(x_ref, w_ref, b_ref, mavg_ref, o_ref):
        # Per-row position inside its sequence: a single (M, 1) int32 plane.
        row_in_seq = lax.broadcasted_iota(jnp.int32, (M, 1), 0) % T
        biases = b_ref[...]                          # (Rb, Cp) f32, one load

        def wmat(i):                                 # (Cp, Cp) bf16 tile
            return w_ref[i * Cp:(i + 1) * Cp, :]

        def bias(i):                                 # (1, Cp) f32
            return biases[i:i + 1, :]

        def shift_rows(a, shift):
            # xs[m] = a[m - shift] if the source row is in the same sequence,
            # else 0 (== Conv1d(padding=(K-1)*d) + Chomp1d).  Roll is XLU;
            # the mask is one VPU select against the (M,1) plane.
            if shift == 0:
                return a
            if shift >= T:
                return jnp.zeros_like(a)
            rolled = pltpu.roll(a, shift, axis=0)
            return jnp.where(row_in_seq >= shift, rolled, 0.0)

        def causal_conv(a, cin, dilation, w_off, b_idx, packed):
            if packed:
                # Lanes >= cin of `a` are exactly zero, so a lane-roll by
                # k*cin places tap k at lanes [k*cin, (k+1)*cin) with zeros
                # elsewhere; summing gives the packed activation and one MXU
                # matmul against the fused (Cp, Cp) weight does all K taps.
                packed_x = None
                for k in range(K):
                    xs = shift_rows(a, (K - 1 - k) * dilation)
                    if k:
                        xs = pltpu.roll(xs, k * cin, axis=1)
                    packed_x = xs if packed_x is None else packed_x + xs
                acc = jnp.dot(packed_x.astype(jnp.bfloat16), wmat(w_off),
                              preferred_element_type=jnp.float32)
            else:
                acc = jnp.zeros((M, Cp), jnp.float32)
                for k in range(K):
                    xs = shift_rows(a, (K - 1 - k) * dilation)
                    acc = acc + jnp.dot(xs.astype(jnp.bfloat16),
                                        wmat(w_off + k),
                                        preferred_element_type=jnp.float32)
            return acc + bias(b_idx)                 # bias add stays f32

        a = x_ref[...]                               # f32 activation (M, Cp)
        for blk in blocks:
            d = blk["dilation"]
            h = jnp.maximum(
                causal_conv(a, blk["cin"], d, blk["w1"], blk["b1"],
                            blk["packed1"]), 0.0)
            # TODO(synk): dropout treated as identity (inference/eval mode).
            h = jnp.maximum(
                causal_conv(h, blk["cout"], d, blk["w2"], blk["b2"],
                            blk["packed2"]), 0.0)
            if blk["wd"] is not None:
                res = jnp.dot(a.astype(jnp.bfloat16), wmat(blk["wd"]),
                              preferred_element_type=jnp.float32) \
                      + bias(blk["bd"])
            else:
                res = a
            a = jnp.maximum(h + res, 0.0)

        # Mean over time via the precomputed (Bp, M) averaging matrix.
        feat = jnp.dot(mavg_ref[...], a.astype(jnp.bfloat16),
                       preferred_element_type=jnp.float32)
        emb = jnp.dot(feat.astype(jnp.bfloat16), wmat(cfg["wp_off"]),
                      preferred_element_type=jnp.float32) + bias(cfg["bp_idx"])
        recon = jnp.dot(emb.astype(jnp.bfloat16), wmat(cfg["wdec_off"]),
                        preferred_element_type=jnp.float32) + bias(cfg["bdec_idx"])
        o_ref[...] = recon.astype(o_ref.dtype)       # dense (Bp, Cp) store

    return kernel


# ---------------------------------------------------------------------------
# Config + one-time parameter layout prep (NOT in the forward hot path)
# ---------------------------------------------------------------------------
def make_config(*, batch, input_size, num_channels, kernel_size, emb_dim,
                window_size, seq_len):
    channels = [input_size] + list(num_channels)
    Cp = _rup(max(channels + [emb_dim, window_size]), LANE)
    M = _rup(batch * seq_len, SUBLANE)
    Bp = _rup(batch, SUBLANE)

    blocks = []
    w_off = 0
    b_idx = 0
    for i, (cin, cout) in enumerate(zip(channels[:-1], channels[1:])):
        packed1 = kernel_size * cin <= Cp
        packed2 = kernel_size * cout <= Cp
        blk = dict(cin=cin, cout=cout, dilation=2 ** i,
                   packed1=packed1, packed2=packed2, w1=w_off, b1=b_idx)
        w_off += 1 if packed1 else kernel_size
        b_idx += 1
        blk["w2"], blk["b2"] = w_off, b_idx
        w_off += 1 if packed2 else kernel_size
        b_idx += 1
        if cin != cout:
            blk["wd"], blk["bd"] = w_off, b_idx
            w_off += 1
            b_idx += 1
        else:
            blk["wd"] = blk["bd"] = None
        blocks.append(blk)
    wp_off, w_off = w_off, w_off + 1
    bp_idx, b_idx = b_idx, b_idx + 1
    wdec_off, w_off = w_off, w_off + 1
    bdec_idx, b_idx = b_idx, b_idx + 1
    Rb = _rup(b_idx, SUBLANE)

    # Explicit scoped-VMEM budget: double-buffered in/out slabs + headroom for
    # in-kernel temporaries, clamped well under v7x's 64 MiB physical VMEM.
    est = 2 * (M * Cp * 4 + w_off * Cp * Cp * 2 + Rb * Cp * 4
               + Bp * M * 2 + Bp * Cp * 4) + 12 * M * Cp * 4 + (2 << 20)
    vmem_limit = int(min(48 << 20, max(16 << 20, est)))

    return dict(kernel_size=kernel_size, B=batch, T=seq_len, M=M, Bp=Bp,
                Cp=Cp, channels=channels, emb_dim=emb_dim,
                window_size=window_size, blocks=blocks, n_w=w_off, Rb=Rb,
                wp_off=wp_off, bp_idx=bp_idx, wdec_off=wdec_off,
                bdec_idx=bdec_idx, vmem_limit=vmem_limit)


def prepare_params(raw, cfg):
    """Fuse all PyTorch-layout params into one bf16 weight slab + one f32 bias
    slab (kernel slices with static offsets) and build the time-avg matrix."""
    K = cfg["kernel_size"]
    Cp = cfg["Cp"]
    w_slab = jnp.zeros((cfg["n_w"] * Cp, Cp), jnp.float32)
    b_slab = jnp.zeros((cfg["Rb"], Cp), jnp.float32)

    def put_conv(ws, w, off, cin, cout, packed):
        # w: (cout, cin, K) PyTorch Conv1d layout.
        for k in range(K):
            base = off * Cp + (k * cin if packed else k * Cp)
            ws = ws.at[base:base + cin, :cout].set(w[:, :, k].T)
        return ws

    for bc, br in zip(cfg["blocks"], raw["blocks"]):
        cin, cout = bc["cin"], bc["cout"]
        w_slab = put_conv(w_slab, br["w1"], bc["w1"], cin, cout, bc["packed1"])
        b_slab = b_slab.at[bc["b1"], :cout].set(br["b1"])
        w_slab = put_conv(w_slab, br["w2"], bc["w2"], cout, cout, bc["packed2"])
        b_slab = b_slab.at[bc["b2"], :cout].set(br["b2"])
        if bc["wd"] is not None:
            base = bc["wd"] * Cp
            w_slab = w_slab.at[base:base + cin, :cout].set(br["wd"][:, :, 0].T)
            b_slab = b_slab.at[bc["bd"], :cout].set(br["bd"])

    c_last = cfg["channels"][-1]
    emb, win = cfg["emb_dim"], cfg["window_size"]
    base = cfg["wp_off"] * Cp
    w_slab = w_slab.at[base:base + c_last, :emb].set(raw["wp"].T)
    b_slab = b_slab.at[cfg["bp_idx"], :emb].set(raw["bp"])
    base = cfg["wdec_off"] * Cp
    w_slab = w_slab.at[base:base + emb, :win].set(raw["wdec"].T)
    b_slab = b_slab.at[cfg["bdec_idx"], :win].set(raw["bdec"])

    B, T, M, Bp = cfg["B"], cfg["T"], cfg["M"], cfg["Bp"]
    col = jnp.arange(M)
    mavg = jnp.where((jnp.arange(Bp)[:, None] == (col // T)[None, :])
                     & (col < B * T)[None, :], 1.0 / T, 0.0)

    return (w_slab.astype(jnp.bfloat16), b_slab, mavg.astype(jnp.bfloat16))


def build_forward(cfg):
    kernel = _make_kernel(cfg)
    vmem = pl.BlockSpec(memory_space=pltpu.MemorySpace.VMEM)
    call = pl.pallas_call(
        kernel,
        out_shape=jax.ShapeDtypeStruct((cfg["Bp"], cfg["Cp"]), jnp.float32),
        in_specs=[vmem] * 4,
        out_specs=vmem,
        compiler_params=pltpu.CompilerParams(
            vmem_limit_bytes=cfg["vmem_limit"]),
    )

    @jax.jit
    def forward(x, w_slab, b_slab, mavg):
        B, c0, T = x.shape
        # (B, C, T) -> (B*T, C): time-major rows within each sequence.
        x2d = jnp.transpose(x, (0, 2, 1)).reshape(B * T, c0)
        x2d = _pad2d(x2d.astype(jnp.float32), cfg["M"], cfg["Cp"])
        out = call(x2d, w_slab, b_slab, mavg)
        # Strip lane/sublane padding; unsqueeze(1) is pure shape glue.
        return out[:B, :cfg["window_size"]][:, None, :]

    return forward


# ---------------------------------------------------------------------------
# Pure-JAX reference (mirrors the PyTorch module, eval mode)
# ---------------------------------------------------------------------------
def _ref_causal_conv(x, w, b, dilation):
    T = x.shape[2]
    K = w.shape[2]
    y = None
    for k in range(K):
        shift = (K - 1 - k) * dilation
        xs = x if shift == 0 else jnp.pad(
            x, ((0, 0), (0, 0), (shift, 0)))[:, :, :T]
        term = jnp.einsum("oc,bct->bot", w[:, :, k], xs, precision="highest")
        y = term if y is None else y + term
    return y + b[None, :, None]


def ref_forward(x, raw):
    a = x
    for i, blk in enumerate(raw["blocks"]):
        d = 2 ** i
        h = jnp.maximum(_ref_causal_conv(a, blk["w1"], blk["b1"], d), 0.0)
        h = jnp.maximum(_ref_causal_conv(h, blk["w2"], blk["b2"], d), 0.0)
        if "wd" in blk:
            res = jnp.einsum("oc,bct->bot", blk["wd"][:, :, 0], a,
                             precision="highest") + blk["bd"][None, :, None]
        else:
            res = a
        a = jnp.maximum(h + res, 0.0)
    feat = jnp.mean(a, axis=2)
    emb = jnp.dot(feat, raw["wp"].T, precision="highest") + raw["bp"]
    recon = jnp.dot(emb, raw["wdec"].T, precision="highest") + raw["bdec"]
    return recon[:, None, :]


# ---------------------------------------------------------------------------
if __name__ == "__main__":
    # Small shapes consistent with TCN_Autoencoder.forward(x): x is
    # (batch, num_stocks, window_size).
    batch, seq_len = 2, 16
    input_size = 4              # num_stocks
    num_channels = [8, 16]
    kernel_size = 3
    emb_dim = 32
    window_size = 16            # decoder reconstructs the window

    cfg = make_config(batch=batch, input_size=input_size,
                      num_channels=num_channels, kernel_size=kernel_size,
                      emb_dim=emb_dim, window_size=window_size,
                      seq_len=seq_len)

    key = jax.random.PRNGKey(0)
    keys = iter(jax.random.split(key, 64))

    def nrm(shape, scale=0.1):
        return jax.random.normal(next(keys), shape, dtype=jnp.float32) * scale

    channels = [input_size] + list(num_channels)
    raw = {"blocks": []}
    for i in range(len(num_channels)):
        cin, cout = channels[i], channels[i + 1]
        blk = {
            "w1": nrm((cout, cin, kernel_size)),
            "b1": nrm((cout,)),
            "w2": nrm((cout, cout, kernel_size)),
            "b2": nrm((cout,)),
        }
        if cin != cout:
            blk["wd"] = nrm((cout, cin, 1))
            blk["bd"] = nrm((cout,))
        raw["blocks"].append(blk)
    raw["wp"] = nrm((emb_dim, channels[-1]))
    raw["bp"] = nrm((emb_dim,))
    raw["wdec"] = nrm((window_size, emb_dim))
    raw["bdec"] = nrm((window_size,))

    x = jax.random.normal(next(keys), (batch, input_size, seq_len),
                          dtype=jnp.float32)

    params = prepare_params(raw, cfg)   # one-time layout prep (off hot path)
    forward = build_forward(cfg)

    out = forward(x, *params)
    out = jax.block_until_ready(out)

    ref = ref_forward(x, raw)
    assert out.shape == (batch, 1, window_size), out.shape
    # Tolerance accommodates bf16 MXU operands (f32 accumulation) vs the
    # 'highest'-precision f32 reference; structural errors would be orders of
    # magnitude larger than this.
    max_err = float(jnp.max(jnp.abs(out - ref)))
    assert jnp.allclose(out, ref, atol=3e-2, rtol=3e-2), max_err

    print("KERNEL_OK")
</pallas_src>

<mosaic_0001>
module attributes {stable_mosaic.version = 11 : i64} {
  func.func @kernel(%arg0: memref<32x128xf32, #tpu.memory_space<vmem>>, %arg1: memref<1024x128xbf16, #tpu.memory_space<vmem>>, %arg2: memref<8x128xf32, #tpu.memory_space<vmem>>, %arg3: memref<8x32xbf16, #tpu.memory_space<vmem>>, %arg4: memref<8x128xf32, #tpu.memory_space<vmem>>) attributes {dimension_semantics = [], scalar_prefetch = 0 : i64, scratch_operands = 0 : i64, tpu.core_type = #tpu.core_type<tc>} {
    %0 = tpu.iota {dimensions = array<i32: 0>} : vector<32x1xi32>
    %c16_i32 = arith.constant 16 : i32
    %c0_i32 = arith.constant 0 : i32
    %1 = arith.cmpi eq, %c16_i32, %c0_i32 : i32
    %c1_i32 = arith.constant 1 : i32
    %2 = arith.select %1, %c1_i32, %c16_i32 : i32
    %3 = vector.broadcast %2 : i32 to vector<32x1xi32>
    %4 = arith.remsi %0, %3 : vector<32x1xi32>
    %c0_i32_0 = arith.constant 0 : i32
    %5 = vector.broadcast %c0_i32_0 : i32 to vector<32x1xi32>
    %6 = arith.cmpi ne, %4, %5 : vector<32x1xi32>
    %c0_i32_1 = arith.constant 0 : i32
    %7 = vector.broadcast %c0_i32_1 : i32 to vector<32x1xi32>
    %8 = arith.cmpi slt, %4, %7 : vector<32x1xi32>
    %c0_i32_2 = arith.constant 0 : i32
    %9 = arith.cmpi slt, %2, %c0_i32_2 : i32
    %10 = vector.broadcast %9 : i1 to vector<32x1xi1>
    %11 = vector.broadcast %10 : vector<32x1xi1> to vector<32x1xi1>
    %12 = arith.xori %8, %11 : vector<32x1xi1>
    %13 = arith.andi %12, %6 : vector<32x1xi1>
    %14 = vector.broadcast %2 : i32 to vector<32x1xi32>
    %15 = arith.addi %4, %14 : vector<32x1xi32>
    %16 = arith.select %13, %15, %4 : vector<32x1xi1>, vector<32x1xi32>
    %c0 = arith.constant 0 : index
    %c0_3 = arith.constant 0 : index
    %17 = vector.load %arg2[%c0, %c0_3] : memref<8x128xf32, #tpu.memory_space<vmem>>, vector<8x128xf32>
    %c0_4 = arith.constant 0 : index
    %c0_5 = arith.constant 0 : index
    %18 = vector.load %arg0[%c0_4, %c0_5] : memref<32x128xf32, #tpu.memory_space<vmem>>, vector<32x128xf32>
    %c2_i32 = arith.constant 2 : i32
    %19 = tpu.dynamic_rotate %18 by %c2_i32 dim 0 : vector<32x128xf32>, i32 -> vector<32x128xf32>
    %c2_i32_6 = arith.constant 2 : i32
    %20 = vector.broadcast %c2_i32_6 : i32 to vector<32x1xi32>
    %21 = arith.cmpi sge, %16, %20 : vector<32x1xi32>
    %cst = arith.constant 0.000000e+00 : f32
    %22 = vector.shape_cast %21 : vector<32x1xi1> to vector<32x1xi1>
    %23 = vector.broadcast %22 : vector<32x1xi1> to vector<32x128xi1>
    %24 = vector.broadcast %cst : f32 to vector<32x128xf32>
    %25 = arith.select %23, %19, %24 : vector<32x128xi1>, vector<32x128xf32>
    %c1_i32_7 = arith.constant 1 : i32
    %26 = tpu.dynamic_rotate %18 by %c1_i32_7 dim 0 : vector<32x128xf32>, i32 -> vector<32x128xf32>
    %c1_i32_8 = arith.constant 1 : i32
    %27 = vector.broadcast %c1_i32_8 : i32 to vector<32x1xi32>
    %28 = arith.cmpi sge, %16, %27 : vector<32x1xi32>
    %cst_9 = arith.constant 0.000000e+00 : f32
    %29 = vector.shape_cast %28 : vector<32x1xi1> to vector<32x1xi1>
    %30 = vector.broadcast %29 : vector<32x1xi1> to vector<32x128xi1>
    %31 = vector.broadcast %cst_9 : f32 to vector<32x128xf32>
    %32 = arith.select %30, %26, %31 : vector<32x128xi1>, vector<32x128xf32>
    %c4_i32 = arith.constant 4 : i32
    %33 = tpu.dynamic_rotate %32 by %c4_i32 dim 1 : vector<32x128xf32>, i32 -> vector<32x128xf32>
    %34 = arith.addf %25, %33 : vector<32x128xf32>
    %c8_i32 = arith.constant 8 : i32
    %35 = tpu.dynamic_rotate %18 by %c8_i32 dim 1 : vector<32x128xf32>, i32 -> vector<32x128xf32>
    %36 = arith.addf %34, %35 : vector<32x128xf32>
    %37 = arith.truncf %36 : vector<32x128xf32> to vector<32x128xbf16>
    %c0_10 = arith.constant 0 : index
    %c0_11 = arith.constant 0 : index
    %38 = vector.load %arg1[%c0_10, %c0_11] : memref<1024x128xbf16, #tpu.memory_space<vmem>>, vector<128x128xbf16>
    %cst_12 = arith.constant dense<0.000000e+00> : vector<32x128xf32>
    %39 = tpu.matmul %37, %38, %cst_12 {dimension_numbers = #tpu.dot_dimension_numbers<[1], [0], [0], [1], [0, 0, 1, 1], [], []>} : vector<32x128xbf16>, vector<128x128xbf16>, vector<32x128xf32> -> vector<32x128xf32>
    %40 = vector.extract_strided_slice %17 {offsets = [0, 0], sizes = [1, 128], strides = [1, 1]} : vector<8x128xf32> to vector<1x128xf32>
    %41 = vector.broadcast %40 : vector<1x128xf32> to vector<32x128xf32>
    %42 = arith.addf %39, %41 : vector<32x128xf32>
    %cst_13 = arith.constant 0.000000e+00 : f32
    %43 = vector.broadcast %cst_13 : f32 to vector<32x128xf32>
    %44 = arith.maximumf %42, %43 : vector<32x128xf32>
    %c2_i32_14 = arith.constant 2 : i32
    %45 = tpu.dynamic_rotate %44 by %c2_i32_14 dim 0 : vector<32x128xf32>, i32 -> vector<32x128xf32>
    %c2_i32_15 = arith.constant 2 : i32
    %46 = vector.broadcast %c2_i32_15 : i32 to vector<32x1xi32>
    %47 = arith.cmpi sge, %16, %46 : vector<32x1xi32>
    %cst_16 = arith.constant 0.000000e+00 : f32
    %48 = vector.shape_cast %47 : vector<32x1xi1> to vector<32x1xi1>
    %49 = vector.broadcast %48 : vector<32x1xi1> to vector<32x128xi1>
    %50 = vector.broadcast %cst_16 : f32 to vector<32x128xf32>
    %51 = arith.select %49, %45, %50 : vector<32x128xi1>, vector<32x128xf32>
    %c1_i32_17 = arith.constant 1 : i32
    %52 = tpu.dynamic_rotate %44 by %c1_i32_17 dim 0 : vector<32x128xf32>, i32 -> vector<32x128xf32>
    %c1_i32_18 = arith.constant 1 : i32
    %53 = vector.broadcast %c1_i32_18 : i32 to vector<32x1xi32>
    %54 = arith.cmpi sge, %16, %53 : vector<32x1xi32>
    %cst_19 = arith.constant 0.000000e+00 : f32
    %55 = vector.shape_cast %54 : vector<32x1xi1> to vector<32x1xi1>
    %56 = vector.broadcast %55 : vector<32x1xi1> to vector<32x128xi1>
    %57 = vector.broadcast %cst_19 : f32 to vector<32x128xf32>
    %58 = arith.select %56, %52, %57 : vector<32x128xi1>, vector<32x128xf32>
    %c8_i32_20 = arith.constant 8 : i32
    %59 = tpu.dynamic_rotate %58 by %c8_i32_20 dim 1 : vector<32x128xf32>, i32 -> vector<32x128xf32>
    %60 = arith.addf %51, %59 : vector<32x128xf32>
    %c16_i32_21 = arith.constant 16 : i32
    %61 = tpu.dynamic_rotate %44 by %c16_i32_21 dim 1 : vector<32x128xf32>, i32 -> vector<32x128xf32>
    %62 = arith.addf %60, %61 : vector<32x128xf32>
    %63 = arith.truncf %62 : vector<32x128xf32> to vector<32x128xbf16>
    %c128 = arith.constant 128 : index
    %c0_22 = arith.constant 0 : index
    %64 = vector.load %arg1[%c128, %c0_22] : memref<1024x128xbf16, #tpu.memory_space<vmem>>, vector<128x128xbf16>
    %cst_23 = arith.constant dense<0.000000e+00> : vector<32x128xf32>
    %65 = tpu.matmul %63, %64, %cst_23 {dimension_numbers = #tpu.dot_dimension_numbers<[1], [0], [0], [1], [0, 0, 1, 1], [], []>} : vector<32x128xbf16>, vector<128x128xbf16>, vector<32x128xf32> -> vector<32x128xf32>
    %66 = vector.extract_strided_slice %17 {offsets = [1, 0], sizes = [1, 128], strides = [1, 1]} : vector<8x128xf32> to vector<1x128xf32>
    %67 = vector.broadcast %66 : vector<1x128xf32> to vector<32x128xf32>
    %68 = arith.addf %65, %67 : vector<32x128xf32>
    %cst_24 = arith.constant 0.000000e+00 : f32
    %69 = vector.broadcast %cst_24 : f32 to vector<32x128xf32>
    %70 = arith.maximumf %68, %69 : vector<32x128xf32>
    %71 = arith.truncf %18 : vector<32x128xf32> to vector<32x128xbf16>
    %c256 = arith.constant 256 : index
    %c0_25 = arith.constant 0 : index
    %72 = vector.load %arg1[%c256, %c0_25] : memref<1024x128xbf16, #tpu.memory_space<vmem>>, vector<128x128xbf16>
    %cst_26 = arith.constant dense<0.000000e+00> : vector<32x128xf32>
    %73 = tpu.matmul %71, %72, %cst_26 {dimension_numbers = #tpu.dot_dimension_numbers<[1], [0], [0], [1], [0, 0, 1, 1], [], []>} : vector<32x128xbf16>, vector<128x128xbf16>, vector<32x128xf32> -> vector<32x128xf32>
    %74 = vector.extract_strided_slice %17 {offsets = [2, 0], sizes = [1, 128], strides = [1, 1]} : vector<8x128xf32> to vector<1x128xf32>
    %75 = vector.broadcast %74 : vector<1x128xf32> to vector<32x128xf32>
    %76 = arith.addf %73, %75 : vector<32x128xf32>
    %77 = arith.addf %70, %76 : vector<32x128xf32>
    %cst_27 = arith.constant 0.000000e+00 : f32
    %78 = vector.broadcast %cst_27 : f32 to vector<32x128xf32>
    %79 = arith.maximumf %77, %78 : vector<32x128xf32>
    %c4_i32_28 = arith.constant 4 : i32
    %80 = tpu.dynamic_rotate %79 by %c4_i32_28 dim 0 : vector<32x128xf32>, i32 -> vector<32x128xf32>
    %c4_i32_29 = arith.constant 4 : i32
    %81 = vector.broadcast %c4_i32_29 : i32 to vector<32x1xi32>
    %82 = arith.cmpi sge, %16, %81 : vector<32x1xi32>
    %cst_30 = arith.constant 0.000000e+00 : f32
    %83 = vector.shape_cast %82 : vector<32x1xi1> to vector<32x1xi1>
    %84 = vector.broadcast %83 : vector<32x1xi1> to vector<32x128xi1>
    %85 = vector.broadcast %cst_30 : f32 to vector<32x128xf32>
    %86 = arith.select %84, %80, %85 : vector<32x128xi1>, vector<32x128xf32>
    %c2_i32_31 = arith.constant 2 : i32
    %87 = tpu.dynamic_rotate %79 by %c2_i32_31 dim 0 : vector<32x128xf32>, i32 -> vector<32x128xf32>
    %c2_i32_32 = arith.constant 2 : i32
    %88 = vector.broadcast %c2_i32_32 : i32 to vector<32x1xi32>
    %89 = arith.cmpi sge, %16, %88 : vector<32x1xi32>
    %cst_33 = arith.constant 0.000000e+00 : f32
    %90 = vector.shape_cast %89 : vector<32x1xi1> to vector<32x1xi1>
    %91 = vector.broadcast %90 : vector<32x1xi1> to vector<32x128xi1>
    %92 = vector.broadcast %cst_33 : f32 to vector<32x128xf32>
    %93 = arith.select %91, %87, %92 : vector<32x128xi1>, vector<32x128xf32>
    %c8_i32_34 = arith.constant 8 : i32
    %94 = tpu.dynamic_rotate %93 by %c8_i32_34 dim 1 : vector<32x128xf32>, i32 -> vector<32x128xf32>
    %95 = arith.addf %86, %94 : vector<32x128xf32>
    %c16_i32_35 = arith.constant 16 : i32
    %96 = tpu.dynamic_rotate %79 by %c16_i32_35 dim 1 : vector<32x128xf32>, i32 -> vector<32x128xf32>
    %97 = arith.addf %95, %96 : vector<32x128xf32>
    %98 = arith.truncf %97 : vector<32x128xf32> to vector<32x128xbf16>
    %c384 = arith.constant 384 : index
    %c0_36 = arith.constant 0 : index
    %99 = vector.load %arg1[%c384, %c0_36] : memref<1024x128xbf16, #tpu.memory_space<vmem>>, vector<128x128xbf16>
    %cst_37 = arith.constant dense<0.000000e+00> : vector<32x128xf32>
    %100 = tpu.matmul %98, %99, %cst_37 {dimension_numbers = #tpu.dot_dimension_numbers<[1], [0], [0], [1], [0, 0, 1, 1], [], []>} : vector<32x128xbf16>, vector<128x128xbf16>, vector<32x128xf32> -> vector<32x128xf32>
    %101 = vector.extract_strided_slice %17 {offsets = [3, 0], sizes = [1, 128], strides = [1, 1]} : vector<8x128xf32> to vector<1x128xf32>
    %102 = vector.broadcast %101 : vector<1x128xf32> to vector<32x128xf32>
    %103 = arith.addf %100, %102 : vector<32x128xf32>
    %cst_38 = arith.constant 0.000000e+00 : f32
    %104 = vector.broadcast %cst_38 : f32 to vector<32x128xf32>
    %105 = arith.maximumf %103, %104 : vector<32x128xf32>
    %c4_i32_39 = arith.constant 4 : i32
    %106 = tpu.dynamic_rotate %105 by %c4_i32_39 dim 0 : vector<32x128xf32>, i32 -> vector<32x128xf32>
    %c4_i32_40 = arith.constant 4 : i32
    %107 = vector.broadcast %c4_i32_40 : i32 to vector<32x1xi32>
    %108 = arith.cmpi sge, %16, %107 : vector<32x1xi32>
    %cst_41 = arith.constant 0.000000e+00 : f32
    %109 = vector.shape_cast %108 : vector<32x1xi1> to vector<32x1xi1>
    %110 = vector.broadcast %109 : vector<32x1xi1> to vector<32x128xi1>
    %111 = vector.broadcast %cst_41 : f32 to vector<32x128xf32>
    %112 = arith.select %110, %106, %111 : vector<32x128xi1>, vector<32x128xf32>
    %c2_i32_42 = arith.constant 2 : i32
    %113 = tpu.dynamic_rotate %105 by %c2_i32_42 dim 0 : vector<32x128xf32>, i32 -> vector<32x128xf32>
    %c2_i32_43 = arith.constant 2 : i32
    %114 = vector.broadcast %c2_i32_43 : i32 to vector<32x1xi32>
    %115 = arith.cmpi sge, %16, %114 : vector<32x1xi32>
    %cst_44 = arith.constant 0.000000e+00 : f32
    %116 = vector.shape_cast %115 : vector<32x1xi1> to vector<32x1xi1>
    %117 = vector.broadcast %116 : vector<32x1xi1> to vector<32x128xi1>
    %118 = vector.broadcast %cst_44 : f32 to vector<32x128xf32>
    %119 = arith.select %117, %113, %118 : vector<32x128xi1>, vector<32x128xf32>
    %c16_i32_45 = arith.constant 16 : i32
    %120 = tpu.dynamic_rotate %119 by %c16_i32_45 dim 1 : vector<32x128xf32>, i32 -> vector<32x128xf32>
    %121 = arith.addf %112, %120 : vector<32x128xf32>
    %c32_i32 = arith.constant 32 : i32
    %122 = tpu.dynamic_rotate %105 by %c32_i32 dim 1 : vector<32x128xf32>, i32 -> vector<32x128xf32>
    %123 = arith.addf %121, %122 : vector<32x128xf32>
    %124 = arith.truncf %123 : vector<32x128xf32> to vector<32x128xbf16>
    %c512 = arith.constant 512 : index
    %c0_46 = arith.constant 0 : index
    %125 = vector.load %arg1[%c512, %c0_46] : memref<1024x128xbf16, #tpu.memory_space<vmem>>, vector<128x128xbf16>
    %cst_47 = arith.constant dense<0.000000e+00> : vector<32x128xf32>
    %126 = tpu.matmul %124, %125, %cst_47 {dimension_numbers = #tpu.dot_dimension_numbers<[1], [0], [0], [1], [0, 0, 1, 1], [], []>} : vector<32x128xbf16>, vector<128x128xbf16>, vector<32x128xf32> -> vector<32x128xf32>
    %127 = vector.extract_strided_slice %17 {offsets = [4, 0], sizes = [1, 128], strides = [1, 1]} : vector<8x128xf32> to vector<1x128xf32>
    %128 = vector.broadcast %127 : vector<1x128xf32> to vector<32x128xf32>
    %129 = arith.addf %126, %128 : vector<32x128xf32>
    %cst_48 = arith.constant 0.000000e+00 : f32
    %130 = vector.broadcast %cst_48 : f32 to vector<32x128xf32>
    %131 = arith.maximumf %129, %130 : vector<32x128xf32>
    %132 = arith.truncf %79 : vector<32x128xf32> to vector<32x128xbf16>
    %c640 = arith.constant 640 : index
    %c0_49 = arith.constant 0 : index
    %133 = vector.load %arg1[%c640, %c0_49] : memref<1024x128xbf16, #tpu.memory_space<vmem>>, vector<128x128xbf16>
    %cst_50 = arith.constant dense<0.000000e+00> : vector<32x128xf32>
    %134 = tpu.matmul %132, %133, %cst_50 {dimension_numbers = #tpu.dot_dimension_numbers<[1], [0], [0], [1], [0, 0, 1, 1], [], []>} : vector<32x128xbf16>, vector<128x128xbf16>, vector<32x128xf32> -> vector<32x128xf32>
    %135 = vector.extract_strided_slice %17 {offsets = [5, 0], sizes = [1, 128], strides = [1, 1]} : vector<8x128xf32> to vector<1x128xf32>
    %136 = vector.broadcast %135 : vector<1x128xf32> to vector<32x128xf32>
    %137 = arith.addf %134, %136 : vector<32x128xf32>
    %138 = arith.addf %131, %137 : vector<32x128xf32>
    %cst_51 = arith.constant 0.000000e+00 : f32
    %139 = vector.broadcast %cst_51 : f32 to vector<32x128xf32>
    %140 = arith.maximumf %138, %139 : vector<32x128xf32>
    %c0_52 = arith.constant 0 : index
    %c0_53 = arith.constant 0 : index
    %141 = vector.load %arg3[%c0_52, %c0_53] : memref<8x32xbf16, #tpu.memory_space<vmem>>, vector<8x32xbf16>
    %142 = arith.truncf %140 : vector<32x128xf32> to vector<32x128xbf16>
    %cst_54 = arith.constant dense<0.000000e+00> : vector<8x128xf32>
    %143 = tpu.matmul %141, %142, %cst_54 {dimension_numbers = #tpu.dot_dimension_numbers<[1], [0], [0], [1], [0, 0, 1, 1], [], []>} : vector<8x32xbf16>, vector<32x128xbf16>, vector<8x128xf32> -> vector<8x128xf32>
    %144 = arith.truncf %143 : vector<8x128xf32> to vector<8x128xbf16>
    %c768 = arith.constant 768 : index
    %c0_55 = arith.constant 0 : index
    %145 = vector.load %arg1[%c768, %c0_55] : memref<1024x128xbf16, #tpu.memory_space<vmem>>, vector<128x128xbf16>
    %cst_56 = arith.constant dense<0.000000e+00> : vector<8x128xf32>
    %146 = tpu.matmul %144, %145, %cst_56 {dimension_numbers = #tpu.dot_dimension_numbers<[1], [0], [0], [1], [0, 0, 1, 1], [], []>} : vector<8x128xbf16>, vector<128x128xbf16>, vector<8x128xf32> -> vector<8x128xf32>
    %147 = vector.extract_strided_slice %17 {offsets = [6, 0], sizes = [1, 128], strides = [1, 1]} : vector<8x128xf32> to vector<1x128xf32>
    %148 = vector.broadcast %147 : vector<1x128xf32> to vector<8x128xf32>
    %149 = arith.addf %146, %148 : vector<8x128xf32>
    %150 = arith.truncf %149 : vector<8x128xf32> to vector<8x128xbf16>
    %c896 = arith.constant 896 : index
    %c0_57 = arith.constant 0 : index
    %151 = vector.load %arg1[%c896, %c0_57] : memref<1024x128xbf16, #tpu.memory_space<vmem>>, vector<128x128xbf16>
    %cst_58 = arith.constant dense<0.000000e+00> : vector<8x128xf32>
    %152 = tpu.matmul %150, %151, %cst_58 {dimension_numbers = #tpu.dot_dimension_numbers<[1], [0], [0], [1], [0, 0, 1, 1], [], []>} : vector<8x128xbf16>, vector<128x128xbf16>, vector<8x128xf32> -> vector<8x128xf32>
    %153 = vector.extract_strided_slice %17 {offsets = [7, 0], sizes = [1, 128], strides = [1, 1]} : vector<8x128xf32> to vector<1x128xf32>
    %154 = vector.broadcast %153 : vector<1x128xf32> to vector<8x128xf32>
    %155 = arith.addf %152, %154 : vector<8x128xf32>
    %c0_59 = arith.constant 0 : index
    %c0_60 = arith.constant 0 : index
    %156 = vector.load %arg4[%c0_59, %c0_60] : memref<8x128xf32, #tpu.memory_space<vmem>>, vector<8x128xf32>
    tpu.vector_store %arg4[%c0_59, %c0_60], %155 {strides = array<i32>} : memref<8x128xf32, #tpu.memory_space<vmem>>, vector<8x128xf32>,
    return
  }
}

</mosaic_0001>

<bundles_post_ra>
// kernel: forward.1
= control target key start
LH: loop header
LB: loop body
LE: loop exit
PB: predicated region body
PF: predicated region fallthrough
CT: control target
= control target key end

     0   :  { %9 = vsyncpa [#allocation3], 0  ;;  %s1748_s15 = smov [#allocation2]   ;;  %s2052_s0 = inlined_call_operand.vmem [shape: f32[32,128], index: 0, kind: input, shape index: {}]   ;;  %s2053_s1 = inlined_call_operand.hbm [shape: bf16[1024,128], index: 1, kind: input, shape index: {}]   ;;  %s2054_s2 = inlined_call_operand.vmem [shape: f32[8,128], index: 2, kind: input, shape index: {}]   ;;  %s2055_s3 = inlined_call_operand.vmem [shape: bf16[8,32], index: 3, kind: input, shape index: {}]   ;;  %s2056_s4 = inlined_call_operand.vmem [shape: f32[8,128], index: 4, kind: output, shape index: {}]  }
   0x1   :  { %s17_s16 = sshll.u32 %s1748_s15, 4  ;;  %s1724_s19 = scalar_lea.hbm %s2053_s1, 8192  ;;  %s18_s16 = int_to_ptr.vmem [resolvable:$true] %s17_s16 }
   0x2   :  { %p1725_p0 = scmp.ne.s32.totalorder %s2053_s1, %s1724_s19  ;;  %p1728_p1 = scmp.lt.u32.totalorder %s1724_s19, %s2053_s1 }
   0x4   :  { %p1730_p2 = pnand %p1728_p1, %p1725_p0 }
   0x6   :  { %1733 = shalt.err (!%p1730_p2)
}
   0x7   :  { %s1734_s24 = scalar_lea.vmem %s18_s16, 8192  ;;  %p1739_p4 = scmp.lt.s32.totalorder %s18_s16, %s18_s16 }
   0x8   :  { %p1735_p3 = scmp.ne.s32.totalorder %s18_s16, %s1734_s24  ;;  %p1740_p5 = scmp.lt.s32.totalorder %s1734_s24, %s1734_s24 }
   0xa   :  { %p1741_p6 = por %p1740_p5, %p1739_p4 }
   0xc   :  { %p1742_p7 = pnand %p1741_p6, %p1735_p3 }
   0xe   :  { %1745 = shalt.err (!%p1742_p7)
}
   0xf   :  { %s1749_s25 = smov 64   ;;  %s1750_s26 = smov 4  }
  0x10   :  { %23 = dma.hbm_to_vmem [thread:$0]  %s2053_s1, 8192, %s18_s16, [#allocation3], %s1749_s25, %s1749_s25, %s1750_s26  }
  0x11   :  { %1746 = dma.done.wait [#allocation3], 8192  }
  0x12   :  { %1747 = vsyncadd [#allocation3], 4294959104  ;;  %v32_v0 = vlaneseq  ;;  %v1805_v5 = vld [vmem:[%s2052_s0 + $0x8] sm:$0xff]  ;;  %v1810_v6 = vld [vmem:[%s2052_s0] sm:$0xff]  ;;  %s1751_s8 = smov 8   ;;  %s1753_s12 = smov 32  }
  0x13   :  { %v1815_v7 = vld [vmem:[%s2052_s0 + $0x10] sm:$0xff]  ;;  %154 = vrot.lane.b32.xlu1 %v1805_v5, %s1751_s8  ;;  %152 = vrot.lane.b32.xlu0 %v1810_v6, %s1751_s8  ;;  %v1826_v8 = vld [vmem:[%s2052_s0 + $0x18] sm:$0xff]  ;;  %v115_v10 = vrot.slane %v1810_v6, 7  ;;  %v116_v11 = vrot.slane %v1805_v5, 7  ;;  %v1660_v12 = vld [vmem:[#allocation2] sm:$0xff]   ;;  %v91_v29 = vrot.slane %v1805_v5, 6 }
  0x14   :  { %v1794_v1 = vshrl.u32 %v32_v0, 7  ;;  %v117_v9 = vrot.slane %v1815_v7, 7  ;;  %v118_v13 = vrot.slane %v1826_v8, 7  ;;  %v1661_v14 = vld [vmem:[#allocation2 + $0x8] sm:$0xff]   ;;  %1484 = vmatprep.subr.bf16.mxu0 %v1660_v12  ;;  %v1662_v21 = vld [vmem:[#allocation2 + $0x10] sm:$0xff]   ;;  %v1663_v22 = vld [vmem:[#allocation2 + $0x18] sm:$0xff]  }
  0x15   :  { %1485 = vmatpush3.bf16.msra.mxu0 %v1660_v12  ;;  %v1664_v23 = vld [vmem:[#allocation2 + $0x20] sm:$0xff]   ;;  %v1665_v24 = vld [vmem:[#allocation2 + $0x28] sm:$0xff]   ;;  %v1666_v25 = vld [vmem:[#allocation2 + $0x30] sm:$0xff]   ;;  %v90_v30 = vrot.slane %v1810_v6, 6  ;;  %v93_v31 = vrot.slane %v1826_v8, 6  ;;  %v92_v32 = vrot.slane %v1815_v7, 6 }
  0x16   :  { %v35_v2 = vadd.s32 16, %v1794_v1  ;;  %v1798_v3 = vand.u32 15, %v1794_v1  ;;  %vm119_vm0 = vcmp.lt.s32.totalorder %v1794_v1, 1  ;;  %1486 = vmatprep.subr.bf16.mxu0 %v1661_v14  ;;  %v1667_v26 = vld [vmem:[#allocation2 + $0x38] sm:$0xff]   ;;  %vm94_vm3 = vcmp.lt.s32.totalorder %v1794_v1, 2  ;;  %v1668_v55 = vld [vmem:[#allocation2 + $0x80] sm:$0xff]  }
  0x17   :  { %v122_v15 = vsel %vm119_vm0, %v115_v10, %v116_v11  ;;  %v121_v16 = vsel %vm119_vm0, %v116_v11, %v117_v9  ;;  %v120_v17 = vsel %vm119_vm0, %v117_v9, %v118_v13  ;;  %v123_v18 = vsel %vm119_vm0, %v118_v13, %v115_v10  ;;  %v1669_v56 = vld [vmem:[#allocation2 + $0x40] sm:$0xff]   ;;  %v1670_v57 = vld [vmem:[#allocation2 + $0x88] sm:$0xff]   ;;  %v1672_v59 = vld [vmem:[#allocation2 + $0x90] sm:$0xff]  }
  0x18   :  { %v1800_v4 = vand.u32 15, %v35_v2  ;;  %vm124_vm1 = vcmp.ge.s32.totalorder %v1798_v3, 1  ;;  %146 = vrot.lane.b32.xlu1 %v120_v17, %s1750_s26  ;;  %142 = vrot.lane.b32.xlu0 %v122_v15, %s1750_s26  ;;  %vm99_vm4 = vcmp.ge.s32.totalorder %v1798_v3, 2  ;;  %v98_v33 = vsel %vm94_vm3, %v93_v31, %v90_v30  ;;  %v1671_v58 = vld [vmem:[#allocation2 + $0x48] sm:$0xff]   ;;  %v1673_v60 = vld [vmem:[#allocation2 + $0x50] sm:$0xff]   ;;  %v1674_v61 = vld [vmem:[#allocation2 + $0x98] sm:$0xff]  }
  0x19   :  { %v136_v20 = vsel %vm124_vm1, %v123_v18, 0.0  ;;  %1487 = vmatpush3.bf16.msra.mxu0 %v1661_v14  ;;  %v97_v36 = vsel %vm94_vm3, %v90_v30, %v91_v29  ;;  %v96_v37 = vsel %vm94_vm3, %v91_v29, %v92_v32  ;;  %v111_v38 = vsel %vm99_vm4, %v98_v33, 0.0  ;;  %1504 = vmatprep.subr.bf16.mxu1 %v1669_v56  ;;  %v1675_v62 = vld [vmem:[#allocation2 + $0x58] sm:$0xff]   ;;  %v1676_v63 = vld [vmem:[#allocation2 + $0xa0] sm:$0xff]   ;;  %v1678_v10 = vld [vmem:[#allocation2 + $0xa8] sm:$0xff]  }
  0x1a   :  { %vm126_vm2 = vcmp.ge.s32.totalorder %v1800_v4, 1  ;;  %1488 = vmatprep.subr.bf16.mxu0 %v1662_v21  ;;  %vm101_vm5 = vcmp.ge.s32.totalorder %v1800_v4, 2  ;;  %v95_v40 = vsel %vm94_vm3, %v92_v32, %v93_v31  ;;  %1505 = vmatpush3.bf16.msra.mxu1 %v1669_v56  ;;  %v184_v0 = vsub.s32 0, %v1794_v1  ;;  %v1677_v2 = vld [vmem:[#allocation2 + $0x60] sm:$0xff]   ;;  %v1679_v12 = vld [vmem:[#allocation2 + $0x68] sm:$0xff]   ;;  %v1683_v30 = vld [vmem:[#allocation2 + $0x78] sm:$0xff]  }
  0x1b   :  { %v138_v19 = vsel %vm126_vm2, %v121_v16, 0.0  ;;  %v113_v42 = vsel %vm101_vm5, %v96_v37, 0.0  ;;  %1506 = vmatprep.subr.bf16.mxu1 %v1671_v58  ;;  %v1876_v9 = vld [vmem:[%s2054_s2] sm:$0xff]  ;;  %v1680_v16 = vld [vmem:[#allocation2 + $0xb0] sm:$0xff]   ;;  %s1752_s2 = smov 16   ;;  %v458_v37 = vpack.c.bf16 %v1805_v5, %v1810_v6  ;;  %vm589_vm6 = vcmp.lt.s32.totalorder %v1794_v1, 4 }
  0x1c   :  { %144 = vrot.lane.b32.xlu1 %v138_v19, %s1750_s26  ;;  %140 = vrot.lane.b32.xlu0 %v136_v20, %s1750_s26  ;;  %v185_v11 = vrot.slane %v1876_v9, %v184_v0  ;;  %v1681_v19 = vld [vmem:[#allocation2 + $0x70] sm:$0xff]   ;;  %vm594_vm7 = vcmp.ge.s32.totalorder %v1798_v3, 4  ;;  %vm596_vm8 = vcmp.ge.s32.totalorder %v1800_v4, 4  ;;  %v1754_v3 = vmov 0.0   ;;  %v1708_v4 = vld [vmem:[#allocation2 + $0x180] sm:$0xff]  }
  0x1d   :  { %1489 = vmatpush3.bf16.msra.mxu0 %v1662_v21  ;;  %vm1755_vm9 = vmmov 0   ;;  %vm1070_vm10 = vcmask 261120  }
  0x1e   :  { %1490 = vmatprep.subr.bf16.mxu0 %v1663_v22  ;;  %1507 = vmatpush3.bf16.msra.mxu1 %v1671_v58 }
  0x1f   :  { %1508 = vmatprep.subr.bf16.mxu1 %v1673_v60 }
  0x20   :  { %158 = vrot.lane.b32.xlu1 %v1826_v8, %s1751_s8  ;;  %156 = vrot.lane.b32.xlu0 %v1815_v7, %s1751_s8 }
  0x21   :  { %1491 = vmatpush3.bf16.msra.mxu0 %v1663_v22 }
  0x22   :  { %1492 = vmatprep.subr.bf16.mxu0 %v1664_v23  ;;  %1509 = vmatpush3.bf16.msra.mxu1 %v1673_v60 }
  0x23   :  { %1510 = vmatprep.subr.bf16.mxu1 %v1675_v62 }
  0x25   :  { %1493 = vmatpush3.bf16.msra.mxu0 %v1664_v23 }
  0x26   :  { %1494 = vmatprep.subr.bf16.mxu0 %v1665_v24  ;;  %1511 = vmatpush3.bf16.msra.mxu1 %v1675_v62 }
  0x27   :  { %1512 = vmatprep.subr.bf16.mxu1 %v1677_v2 }
  0x29   :  { %1495 = vmatpush3.bf16.msra.mxu0 %v1665_v24 }
  0x2a   :  { %1496 = vmatprep.subr.bf16.mxu0 %v1666_v25  ;;  %1513 = vmatpush3.bf16.msra.mxu1 %v1677_v2 }
  0x2b   :  { %1514 = vmatprep.subr.bf16.mxu1 %v1679_v12 }
  0x2d   :  { %1497 = vmatpush3.bf16.msra.mxu0 %v1666_v25 }
  0x2e   :  { %1498 = vmatprep.subr.bf16.mxu0 %v1667_v26  ;;  %1515 = vmatpush3.bf16.msra.mxu1 %v1679_v12 }
  0x2f   :  { %1516 = vmatprep.subr.bf16.mxu1 %v1681_v19 }
  0x31   :  { %1499 = vmatpush3.bf16.msra.mxu0 %v1667_v26  ;;  %v1682_v26 = vld [vmem:[#allocation2 + $0xb8] sm:$0xff]  }
  0x32   :  { %1524 = vmatprep.subr.bf16.mxu0 %v1668_v55  ;;  %1517 = vmatpush3.bf16.msra.mxu1 %v1681_v19  ;;  %v1688_v19 = vld [vmem:[#allocation2 + $0xe0] sm:$0xff]  }
  0x33   :  { %1518 = vmatprep.subr.bf16.mxu1 %v1683_v30 }
  0x36   :  { %1519 = vmatpush3.bf16.msra.mxu1 %v1683_v30 }
  0x85   :  { %v155_v27 = vpop.permute.xlu1 %154  ;;  %v153_v28 = vpop.permute.xlu0 %152 }
  0x8a   :  { %v147_v34 = vpop.permute.xlu1 %146  ;;  %v143_v35 = vpop.permute.xlu0 %142 }
  0x8b   :  { %v149_v39 = vadd.f32 %v143_v35, %v97_v36  ;;  %v151_v45 = vadd.f32 %v147_v34, %v95_v40 }
  0x8d   :  { %v161_v48 = vadd.f32 %v155_v27, %v149_v39 }
  0x8e   :  { %v145_v41 = vpop.permute.xlu1 %144  ;;  %v141_v43 = vpop.permute.xlu0 %140 }
  0x8f   :  { %v148_v44 = vadd.f32 %v141_v43, %v111_v38  ;;  %v150_v46 = vadd.f32 %v145_v41, %v113_v42 }
  0x91   :  { %v160_v47 = vadd.f32 %v153_v28, %v148_v44 }
  0x92   :  { %v159_v49 = vpop.permute.xlu1 %158  ;;  %v157_v50 = vpop.permute.xlu0 %156 }
  0x93   :  { %v163_v51 = vadd.f32 %v159_v49, %v151_v45  ;;  %v162_v52 = vadd.f32 %v157_v50, %v150_v46  ;;  %v164_v53 = vpack.c.bf16 %v161_v48, %v160_v47  ;;  %v459_v45 = vpack.c.bf16 %v1826_v8, %v1815_v7 }
  0x95   :  { %v165_v54 = vpack.c.bf16 %v163_v51, %v162_v52  ;;  %1500 = vmatprep.mubr.bf16.mxu0 %v164_v53 }
  0x97   :  { %1501 = vmatmul.mubr.bf16.vlgmr.msra.gmra.mrb[0].mxu0 %v165_v54 }
  0x98   :  { %1525 = vmatpush3.bf16.msra.mxu0 %v1668_v55  ;;  %1540 = vmatprep.mubr.bf16.mxu0 %v458_v37 }
  0x99   :  { %1526 = vmatprep.subr.bf16.mxu0 %v1670_v57 }
  0x9c   :  { %1527 = vmatpush3.bf16.msra.mxu0 %v1670_v57 }
  0x9d   :  { %1528 = vmatprep.subr.bf16.mxu0 %v1672_v59 }
  0xa0   :  { %1529 = vmatpush3.bf16.msra.mxu0 %v1672_v59 }
  0xa1   :  { %1530 = vmatprep.subr.bf16.mxu0 %v1674_v61 }
  0xa4   :  { %1531 = vmatpush3.bf16.msra.mxu0 %v1674_v61 }
  0xa5   :  { %1532 = vmatprep.subr.bf16.mxu0 %v1676_v63 }
  0xa8   :  { %1533 = vmatpush3.bf16.msra.mxu0 %v1676_v63 }
  0xa9   :  { %1534 = vmatprep.subr.bf16.mxu0 %v1678_v10 }
  0xac   :  { %1535 = vmatpush3.bf16.msra.mxu0 %v1678_v10 }
  0xad   :  { %1536 = vmatprep.subr.bf16.mxu0 %v1680_v16 }
  0xb0   :  { %1537 = vmatpush3.bf16.msra.mxu0 %v1680_v16  ;;  %v1687_v16 = vld [vmem:[#allocation2 + $0xd8] sm:$0xff]  }
  0xb1   :  { %1538 = vmatprep.subr.bf16.mxu0 %v1682_v26 }
  0xb4   :  { %1539 = vmatpush3.bf16.msra.mxu0 %v1682_v26  ;;  %v1689_v26 = vld [vmem:[#allocation2 + $0xe8] sm:$0xff]  }
  0xb7   :  { %1541 = vmatmul.mubr.bf16.vlgmr.msra.gmra.mrb[4].mxu0 %v459_v45  ;;  %v1691_v45 = vld [vmem:[#allocation2 + $0xf8] sm:$0xff]  }
 0x16a   :  { %v1502_v13 = vpop.f32.mrb[0].mxu0 }
 0x16b   :  { %v277_v14 = vadd.f32 %v1502_v13, %v185_v11  ;;  %v268_v15 = vpop.f32.mrb[1].mxu0  ;;  %v1684_v13 = vld [vmem:[#allocation2 + $0xc0] sm:$0xff]  }
 0x16c   :  { %v269_v17 = vadd.f32 %v268_v15, %v185_v11  ;;  %v1503_v18 = vpop.f32.mrb[2].mxu0  ;;  %1544 = vmatprep.subr.bf16.mxu1 %v1684_v13  ;;  %v1686_v15 = vld [vmem:[#allocation2 + $0xd0] sm:$0xff]  }
 0x16d   :  { %v285_v20 = vmax.f32 %v277_v14, 0.0  ;;  %v280_v21 = vadd.f32 %v1503_v18, %v185_v11  ;;  %v271_v22 = vpop.f32.mrb[3].mxu0  ;;  %v1685_v14 = vld [vmem:[#allocation2 + $0xc8] sm:$0xff]   ;;  %v355_v18 = vsub.s32 1, %v1794_v1 }
 0x16e   :  { %v283_v23 = vmax.f32 %v269_v17, 0.0  ;;  %v272_v24 = vadd.f32 %v271_v22, %v185_v11  ;;  %v478_v17 = vsub.s32 2, %v1794_v1 }
 0x16f   :  { %v286_v25 = vmax.f32 %v280_v21, 0.0  ;;  %v289_v31 = vrot.slane %v285_v20, 6  ;;  %v301_v32 = vrot.slane %v285_v20, 7  ;;  %v356_v21 = vrot.slane %v1876_v9, %v355_v18 }
 0x170   :  { %v287_v27 = vrot.slane %v283_v23, 6  ;;  %v299_v28 = vrot.slane %v283_v23, 7  ;;  %v284_v29 = vmax.f32 %v272_v24, 0.0  ;;  %323 = vrot.lane.b32.xlu0 %v283_v23, %s1752_s2 }
 0x171   :  { %v290_v33 = vrot.slane %v286_v25, 6  ;;  %v302_v34 = vrot.slane %v286_v25, 7 }
 0x172   :  { %v288_v35 = vrot.slane %v284_v29, 6  ;;  %v300_v36 = vrot.slane %v284_v29, 7  ;;  %325 = vrot.lane.b32.xlu1 %v284_v29, %s1752_s2 }
 0x173   :  { %v306_v38 = vsel %vm119_vm0, %v302_v34, %v299_v28  ;;  %v303_v39 = vsel %vm119_vm0, %v301_v32, %v302_v34  ;;  %v294_v40 = vsel %vm94_vm3, %v290_v33, %v287_v27  ;;  %v291_v41 = vsel %vm94_vm3, %v289_v31, %v290_v33 }
 0x174   :  { %v307_v42 = vsel %vm124_vm1, %v306_v38, 0.0  ;;  %v304_v43 = vsel %vm119_vm0, %v300_v36, %v301_v32  ;;  %v305_v5 = vsel %vm119_vm0, %v299_v28, %v300_v36  ;;  %v292_v6 = vsel %vm94_vm3, %v288_v35, %v289_v31  ;;  %v1690_v38 = vld [vmem:[#allocation2 + $0xf0] sm:$0xff]  }
 0x175   :  { %311 = vrot.lane.b32.xlu0 %v307_v42, %s1751_s8  ;;  %v293_v44 = vsel %vm94_vm3, %v287_v27, %v288_v35  ;;  %v309_v46 = vsel %vm126_vm2, %v304_v43, 0.0  ;;  %v295_v7 = vsel %vm99_vm4, %v294_v40, 0.0  ;;  %v297_v53 = vsel %vm101_vm5, %v292_v6, 0.0 }
 0x176   :  { %317 = vrot.lane.b32.xlu1 %v303_v39, %s1751_s8 }
 0x179   :  { %315 = vrot.lane.b32.xlu0 %v309_v46, %s1751_s8 }
 0x17a   :  { %313 = vrot.lane.b32.xlu1 %v305_v5, %s1751_s8 }
 0x17d   :  { %327 = vrot.lane.b32.xlu0 %v285_v20, %s1752_s2  ;;  %v479_v20 = vrot.slane %v1876_v9, %v478_v17 }
 0x17e   :  { %329 = vrot.lane.b32.xlu1 %v286_v25, %s1752_s2 }
 0x18a   :  { %v1542_v2 = vpop.f32.mrb[4].mxu0 }
 0x18b   :  { %v562_v10 = vpop.f32.mrb[5].mxu0  ;;  %v571_v23 = vadd.f32 %v1542_v2, %v479_v20 }
 0x18c   :  { %v1543_v11 = vpop.f32.mrb[6].mxu0  ;;  %v563_v27 = vadd.f32 %v562_v10, %v479_v20 }
 0x18d   :  { %v565_v12 = vpop.f32.mrb[7].mxu0  ;;  %v574_v36 = vadd.f32 %v1543_v11, %v479_v20 }
 0x18e   :  { %v566_v40 = vadd.f32 %v565_v12, %v479_v20 }
 0x1e2   :  { %v324_v47 = vpop.permute.xlu0 %323 }
 0x1e4   :  { %v326_v48 = vpop.permute.xlu1 %325 }
 0x1e7   :  { %v312_v49 = vpop.permute.xlu0 %311 }
 0x1e8   :  { %v318_v50 = vpop.permute.xlu1 %317  ;;  %v319_v8 = vadd.f32 %v312_v49, %v295_v7 }
 0x1e9   :  { %v322_v56 = vadd.f32 %v318_v50, %v291_v41 }
 0x1ea   :  { %v331_v58 = vadd.f32 %v324_v47, %v319_v8 }
 0x1eb   :  { %v316_v51 = vpop.permute.xlu0 %315 }
 0x1ec   :  { %v314_v52 = vpop.permute.xlu1 %313  ;;  %v321_v55 = vadd.f32 %v316_v51, %v297_v53 }
 0x1ed   :  { %v320_v54 = vadd.f32 %v314_v52, %v293_v44 }
 0x1ef   :  { %v328_v57 = vpop.permute.xlu0 %327  ;;  %v332_v59 = vadd.f32 %v326_v48, %v320_v54 }
 0x1f0   :  { %v333_v60 = vadd.f32 %v328_v57, %v321_v55  ;;  %v330_v61 = vpop.permute.xlu1 %329 }
 0x1f1   :  { %v334_v62 = vadd.f32 %v330_v61, %v322_v56  ;;  %v335_v63 = vpack.c.bf16 %v332_v59, %v331_v58  ;;  %v1692_v59 = vld [vmem:[#allocation2 + $0x140] sm:$0xff]  }
 0x1f3   :  { %v336_v0 = vpack.c.bf16 %v334_v62, %v333_v60  ;;  %1520 = vmatprep.mubr.bf16.mxu1 %v335_v63 }
 0x1f5   :  { %1521 = vmatmul.mubr.bf16.vlgmr.msra.gmra.mrb[0].mxu1 %v336_v0 }
 0x1f6   :  { %1545 = vmatpush3.bf16.msra.mxu1 %v1684_v13 }
 0x1f7   :  { %1546 = vmatprep.subr.bf16.mxu1 %v1685_v14 }
 0x1fa   :  { %1547 = vmatpush3.bf16.msra.mxu1 %v1685_v14 }
 0x1fb   :  { %1548 = vmatprep.subr.bf16.mxu1 %v1686_v15 }
 0x1fe   :  { %1549 = vmatpush3.bf16.msra.mxu1 %v1686_v15 }
 0x1ff   :  { %1550 = vmatprep.subr.bf16.mxu1 %v1687_v16 }
 0x202   :  { %1551 = vmatpush3.bf16.msra.mxu1 %v1687_v16 }
 0x203   :  { %1552 = vmatprep.subr.bf16.mxu1 %v1688_v19 }
 0x206   :  { %1553 = vmatpush3.bf16.msra.mxu1 %v1688_v19 }
 0x207   :  { %1554 = vmatprep.subr.bf16.mxu1 %v1689_v26 }
 0x20a   :  { %1555 = vmatpush3.bf16.msra.mxu1 %v1689_v26 }
 0x20b   :  { %1556 = vmatprep.subr.bf16.mxu1 %v1690_v38 }
 0x20e   :  { %1557 = vmatpush3.bf16.msra.mxu1 %v1690_v38  ;;  %v1701_v38 = vld [vmem:[#allocation2 + $0x108] sm:$0xff]  }
 0x20f   :  { %1558 = vmatprep.subr.bf16.mxu1 %v1691_v45 }
 0x212   :  { %1559 = vmatpush3.bf16.msra.mxu1 %v1691_v45 }
 0x213   :  { %1584 = vmatprep.subr.bf16.mxu1 %v1692_v59 }
 0x2c8   :  { %v1522_v22 = vpop.f32.mrb[0].mxu1 }
 0x2c9   :  { %v448_v24 = vadd.f32 %v1522_v22, %v356_v21  ;;  %v439_v25 = vpop.f32.mrb[1].mxu1 }
 0x2ca   :  { %v440_v28 = vadd.f32 %v439_v25, %v356_v21  ;;  %v1523_v29 = vpop.f32.mrb[2].mxu1 }
 0x2cb   :  { %v456_v30 = vmax.f32 %v448_v24, 0.0  ;;  %v451_v31 = vadd.f32 %v1523_v29, %v356_v21  ;;  %v442_v32 = vpop.f32.mrb[3].mxu1 }
 0x2cc   :  { %v454_v33 = vmax.f32 %v440_v28, 0.0  ;;  %v443_v34 = vadd.f32 %v442_v32, %v356_v21  ;;  %v1695_v32 = vld [vmem:[#allocation2 + $0x158] sm:$0xff]  }
 0x2cd   :  { %v579_v35 = vadd.f32 %v571_v23, %v456_v30  ;;  %v457_v37 = vmax.f32 %v451_v31, 0.0  ;;  %v1693_v30 = vld [vmem:[#allocation2 + $0x148] sm:$0xff]   ;;  %v1694_v31 = vld [vmem:[#allocation2 + $0x150] sm:$0xff]  }
 0x2ce   :  { %v577_v39 = vadd.f32 %v563_v27, %v454_v33  ;;  %v455_v41 = vmax.f32 %v443_v34, 0.0  ;;  %v1696_v33 = vld [vmem:[#allocation2 + $0x160] sm:$0xff]   ;;  %v1697_v34 = vld [vmem:[#allocation2 + $0x168] sm:$0xff]  }
 0x2cf   :  { %v1919_v42 = vmax.f32 %v579_v35, 0.0  ;;  %v580_v43 = vadd.f32 %v574_v36, %v457_v37  ;;  %v1698_v35 = vld [vmem:[#allocation2 + $0x170] sm:$0xff]   ;;  %v1699_v36 = vld [vmem:[#allocation2 + $0x178] sm:$0xff]   ;;  %v1700_v37 = vld [vmem:[#allocation2 + $0x100] sm:$0xff]  }
 0x2d0   :  { %v1921_v5 = vmax.f32 %v577_v39, 0.0  ;;  %v578_v6 = vadd.f32 %v566_v40, %v455_v41  ;;  %1564 = vmatprep.subr.bf16.mxu0 %v1700_v37  ;;  %v1702_v39 = vld [vmem:[#allocation2 + $0x110] sm:$0xff]   ;;  %v1703_v40 = vld [vmem:[#allocation2 + $0x118] sm:$0xff]   ;;  %v666_v41 = vsub.s32 3, %v1794_v1 }
 0x2d1   :  { %v1923_v44 = vmax.f32 %v580_v43, 0.0  ;;  %v612_v48 = vrot.slane %v1919_v42, 6  ;;  %v587_v8 = vrot.slane %v1919_v42, 4  ;;  %1565 = vmatpush3.bf16.msra.mxu0 %v1700_v37  ;;  %v1704_v43 = vld [vmem:[#allocation2 + $0x120] sm:$0xff]  }
 0x2d2   :  { %v582_v46 = vmax.f32 %v578_v6, 0.0  ;;  %634 = vrot.lane.b32.xlu0 %v1921_v5, %s1752_s2  ;;  %v610_v47 = vrot.slane %v1921_v5, 6  ;;  %v585_v49 = vrot.slane %v1921_v5, 4  ;;  %1566 = vmatprep.subr.bf16.mxu0 %v1701_v38 }
 0x2d3   :  { %v613_v50 = vrot.slane %v1923_v44, 6  ;;  %v588_v7 = vrot.slane %v1923_v44, 4  ;;  %v941_v51 = vpack.c.bf16 %v1923_v44, %v1919_v42 }
 0x2d4   :  { %636 = vrot.lane.b32.xlu1 %v582_v46, %s1752_s2  ;;  %v611_v52 = vrot.slane %v582_v46, 6  ;;  %v586_v53 = vrot.slane %v582_v46, 4  ;;  %v940_v54 = vpack.c.bf16 %v582_v46, %v1921_v5  ;;  %v667_v5 = vrot.slane %v1876_v9, %v666_v41  ;;  %v1709_v41 = vld [vmem:[#allocation2 + $0x188] sm:$0xff]  }
 0x2d5   :  { %v617_v55 = vsel %vm94_vm3, %v613_v50, %v610_v47  ;;  %v614_v56 = vsel %vm94_vm3, %v612_v48, %v613_v50  ;;  %v593_v57 = vsel %vm589_vm6, %v588_v7, %v585_v49  ;;  %v590_v58 = vsel %vm589_vm6, %v587_v8, %v588_v7  ;;  %1567 = vmatpush3.bf16.msra.mxu0 %v1701_v38 }
 0x2d6   :  { %v618_v60 = vsel %vm99_vm4, %v617_v55, 0.0  ;;  %v615_v61 = vsel %vm94_vm3, %v611_v52, %v612_v48  ;;  %v616_v62 = vsel %vm94_vm3, %v610_v47, %v611_v52  ;;  %v591_v63 = vsel %vm589_vm6, %v586_v53, %v587_v8  ;;  %1568 = vmatprep.subr.bf16.mxu0 %v1702_v39  ;;  %v1706_v48 = vld [vmem:[#allocation2 + $0x130] sm:$0xff]  }
 0x2d7   :  { %622 = vrot.lane.b32.xlu0 %v618_v60, %s1751_s8  ;;  %v592_v0 = vsel %vm589_vm6, %v585_v49, %v586_v53  ;;  %v620_v2 = vsel %vm101_vm5, %v615_v61, 0.0  ;;  %v606_v14 = vsel %vm594_vm7, %v593_v57, 0.0  ;;  %v608_v18 = vsel %vm596_vm8, %v591_v63, 0.0 }
 0x2d8   :  { %628 = vrot.lane.b32.xlu1 %v614_v56, %s1751_s8  ;;  %v1707_v56 = vld [vmem:[#allocation2 + $0x138] sm:$0xff]  }
 0x2d9   :  { %1569 = vmatpush3.bf16.msra.mxu0 %v1702_v39 }
 0x2da   :  { %1570 = vmatprep.subr.bf16.mxu0 %v1703_v40 }
 0x2db   :  { %626 = vrot.lane.b32.xlu0 %v620_v2, %s1751_s8 }
 0x2dc   :  { %624 = vrot.lane.b32.xlu1 %v616_v62, %s1751_s8 }
 0x2dd   :  { %1571 = vmatpush3.bf16.msra.mxu0 %v1703_v40 }
 0x2de   :  { %1572 = vmatprep.subr.bf16.mxu0 %v1704_v43 }
 0x2df   :  { %638 = vrot.lane.b32.xlu0 %v1919_v42, %s1752_s2  ;;  %v1705_v42 = vld [vmem:[#allocation2 + $0x128] sm:$0xff]  }
 0x2e0   :  { %640 = vrot.lane.b32.xlu1 %v1923_v44, %s1752_s2 }
 0x2e1   :  { %1573 = vmatpush3.bf16.msra.mxu0 %v1704_v43  ;;  %v1710_v43 = vld [vmem:[#allocation2 + $0x190] sm:$0xff]  }
 0x2e2   :  { %1574 = vmatprep.subr.bf16.mxu0 %v1705_v42 }
 0x2e5   :  { %1575 = vmatpush3.bf16.msra.mxu0 %v1705_v42  ;;  %v1712_v42 = vld [vmem:[#allocation2 + $0x1a0] sm:$0xff]  }
 0x2e6   :  { %1576 = vmatprep.subr.bf16.mxu0 %v1706_v48 }
 0x2e9   :  { %1577 = vmatpush3.bf16.msra.mxu0 %v1706_v48 }
 0x2ea   :  { %1578 = vmatprep.subr.bf16.mxu0 %v1707_v56 }
 0x2ed   :  { %1579 = vmatpush3.bf16.msra.mxu0 %v1707_v56 }
 0x2ee   :  { %1604 = vmatprep.subr.bf16.mxu0 %v1754_v3 }
 0x344   :  { %v635_v10 = vpop.permute.xlu0 %634 }
 0x346   :  { %v637_v11 = vpop.permute.xlu1 %636 }
 0x349   :  { %v623_v12 = vpop.permute.xlu0 %622 }
 0x34a   :  { %v629_v13 = vpop.permute.xlu1 %628  ;;  %v630_v15 = vadd.f32 %v623_v12, %v606_v14 }
 0x34b   :  { %v633_v22 = vadd.f32 %v629_v13, %v590_v58 }
 0x34c   :  { %v642_v21 = vadd.f32 %v635_v10, %v630_v15 }
 0x34d   :  { %v627_v16 = vpop.permute.xlu0 %626 }
 0x34e   :  { %v625_v17 = vpop.permute.xlu1 %624  ;;  %v632_v20 = vadd.f32 %v627_v16, %v608_v18 }
 0x34f   :  { %v631_v19 = vadd.f32 %v625_v17, %v592_v0 }
 0x351   :  { %v643_v23 = vadd.f32 %v637_v11, %v631_v19  ;;  %v639_v24 = vpop.permute.xlu0 %638 }
 0x352   :  { %v644_v25 = vadd.f32 %v639_v24, %v632_v20  ;;  %v641_v26 = vpop.permute.xlu1 %640 }
 0x353   :  { %v645_v27 = vadd.f32 %v641_v26, %v633_v22  ;;  %v646_v28 = vpack.c.bf16 %v643_v23, %v642_v21 }
 0x355   :  { %v647_v29 = vpack.c.bf16 %v645_v27, %v644_v25  ;;  %1560 = vmatprep.mubr.bf16.mxu1 %v646_v28 }
 0x357   :  { %1561 = vmatmul.mubr.bf16.vlgmr.msra.gmra.mrb[4].mxu1 %v647_v29 }
 0x358   :  { %1585 = vmatpush3.bf16.msra.mxu1 %v1692_v59  ;;  %1600 = vmatprep.mubr.bf16.mxu1 %v940_v54 }
 0x359   :  { %1586 = vmatprep.subr.bf16.mxu1 %v1693_v30 }
 0x35c   :  { %1587 = vmatpush3.bf16.msra.mxu1 %v1693_v30 }
 0x35d   :  { %1588 = vmatprep.subr.bf16.mxu1 %v1694_v31 }
 0x360   :  { %1589 = vmatpush3.bf16.msra.mxu1 %v1694_v31 }
 0x361   :  { %1590 = vmatprep.subr.bf16.mxu1 %v1695_v32 }
 0x364   :  { %1591 = vmatpush3.bf16.msra.mxu1 %v1695_v32 }
 0x365   :  { %1592 = vmatprep.subr.bf16.mxu1 %v1696_v33 }
 0x368   :  { %1593 = vmatpush3.bf16.msra.mxu1 %v1696_v33 }
 0x369   :  { %1594 = vmatprep.subr.bf16.mxu1 %v1697_v34 }
 0x36c   :  { %1595 = vmatpush3.bf16.msra.mxu1 %v1697_v34 }
 0x36d   :  { %1596 = vmatprep.subr.bf16.mxu1 %v1698_v35 }
 0x370   :  { %1597 = vmatpush3.bf16.msra.mxu1 %v1698_v35 }
 0x371   :  { %1598 = vmatprep.subr.bf16.mxu1 %v1699_v36 }
 0x374   :  { %1599 = vmatpush3.bf16.msra.mxu1 %v1699_v36 }
 0x375   :  { %1612 = vmatprep.subr.bf16.mxu1 %v1754_v3 }
 0x377   :  { %1601 = vmatmul.mubr.bf16.vlgmr.msra.gmra.mrb[8].mxu1 %v941_v51 }
 0x378   :  { %1628 = vmatprep.mubr.msk.bf16.mxu1 %vm1755_vm9, %v1754_v3  ;;  %1613 = vmatpush3.bf16.msra.mxu1 %v1708_v4 }
 0x379   :  { %1614 = vmatprep.subr.bf16.mxu1 %v1754_v3 }
 0x37c   :  { %1615 = vmatpush3.bf16.msra.mxu1 %v1709_v41 }
 0x37d   :  { %1616 = vmatprep.subr.bf16.mxu1 %v1754_v3 }
 0x380   :  { %1617 = vmatpush3.bf16.msra.mxu1 %v1710_v43 }
 0x381   :  { %1618 = vmatprep.subr.bf16.mxu1 %v1754_v3 }
 0x42a   :  { %v1562_v6 = vpop.f32.mrb[4].mxu1 }
 0x42b   :  { %v759_v44 = vadd.f32 %v1562_v6, %v667_v5  ;;  %v750_v45 = vpop.f32.mrb[5].mxu1  ;;  %v1713_v6 = vld [vmem:[#allocation2 + $0x1a8] sm:$0xff]  }
 0x42c   :  { %v751_v46 = vadd.f32 %v750_v45, %v667_v5  ;;  %v1563_v47 = vpop.f32.mrb[6].mxu1  ;;  %v837_v45 = vsub.s32 4, %v1794_v1 }
 0x42d   :  { %v767_v49 = vmax.f32 %v759_v44, 0.0  ;;  %v762_v50 = vadd.f32 %v1563_v47, %v667_v5  ;;  %v753_v7 = vpop.f32.mrb[7].mxu1  ;;  %v1714_v44 = vld [vmem:[#allocation2 + $0x1b0] sm:$0xff]  }
 0x42e   :  { %v765_v8 = vmax.f32 %v751_v46, 0.0  ;;  %v754_v51 = vadd.f32 %v753_v7, %v667_v5  ;;  %v1711_v5 = vld [vmem:[#allocation2 + $0x198] sm:$0xff]   ;;  %v960_v46 = vsub.s32 5, %v1794_v1  ;;  %v838_v47 = vrot.slane %v1876_v9, %v837_v45 }
 0x42f   :  { %v768_v52 = vmax.f32 %v762_v50, 0.0  ;;  %v771_v57 = vrot.slane %v767_v49, 4  ;;  %v783_v58 = vrot.slane %v767_v49, 6  ;;  %1619 = vmatpush3.bf16.msra.mxu1 %v1711_v5 }
 0x430   :  { %v769_v53 = vrot.slane %v765_v8, 4  ;;  %v781_v54 = vrot.slane %v765_v8, 6  ;;  %v766_v55 = vmax.f32 %v754_v51, 0.0  ;;  %805 = vrot.lane.b32.xlu0 %v765_v8, %s1753_s12  ;;  %1620 = vmatprep.subr.bf16.mxu1 %v1754_v3  ;;  %v961_v48 = vrot.slane %v1876_v9, %v960_v46 }
 0x431   :  { %v772_v59 = vrot.slane %v768_v52, 4  ;;  %v784_v60 = vrot.slane %v768_v52, 6 }
 0x432   :  { %v770_v61 = vrot.slane %v766_v55, 4  ;;  %v782_v62 = vrot.slane %v766_v55, 6  ;;  %807 = vrot.lane.b32.xlu1 %v766_v55, %s1753_s12 }
 0x433   :  { %v788_v63 = vsel %vm94_vm3, %v784_v60, %v781_v54  ;;  %v785_v0 = vsel %vm94_vm3, %v783_v58, %v784_v60  ;;  %v776_v2 = vsel %vm589_vm6, %v772_v59, %v769_v53  ;;  %v773_v10 = vsel %vm589_vm6, %v771_v57, %v772_v59  ;;  %1621 = vmatpush3.bf16.msra.mxu1 %v1712_v42 }
 0x434   :  { %v789_v11 = vsel %vm99_vm4, %v788_v63, 0.0  ;;  %v786_v12 = vsel %vm94_vm3, %v782_v62, %v783_v58  ;;  %v787_v13 = vsel %vm94_vm3, %v781_v54, %v782_v62  ;;  %v774_v14 = vsel %vm589_vm6, %v770_v61, %v771_v57  ;;  %1622 = vmatprep.subr.bf16.mxu1 %v1754_v3 }
 0x435   :  { %793 = vrot.lane.b32.xlu0 %v789_v11, %s1752_s2  ;;  %v775_v15 = vsel %vm589_vm6, %v769_v53, %v770_v61  ;;  %v791_v16 = vsel %vm101_vm5, %v786_v12, 0.0  ;;  %v777_v25 = vsel %vm594_vm7, %v776_v2, 0.0  ;;  %v779_v29 = vsel %vm596_vm8, %v774_v14, 0.0 }
 0x436   :  { %799 = vrot.lane.b32.xlu1 %v785_v0, %s1752_s2 }
 0x437   :  { %1623 = vmatpush3.bf16.msra.mxu1 %v1713_v6 }
 0x438   :  { %1624 = vmatprep.subr.bf16.mxu1 %v1754_v3 }
 0x439   :  { %797 = vrot.lane.b32.xlu0 %v791_v16, %s1752_s2 }
 0x43a   :  { %795 = vrot.lane.b32.xlu1 %v787_v13, %s1752_s2 }
 0x43b   :  { %1625 = vmatpush3.bf16.msra.mxu1 %v1714_v44 }
 0x43c   :  { %1626 = vmatprep.subr.bf16.mxu1 %v1754_v3 }
 0x43d   :  { %809 = vrot.lane.b32.xlu0 %v767_v49, %s1753_s12 }
 0x43e   :  { %811 = vrot.lane.b32.xlu1 %v768_v52, %s1753_s12 }
 0x44a   :  { %v1602_v17 = vpop.f32.mrb[8].mxu1 }
 0x44b   :  { %v2001_v18 = vpop.f32.mrb[9].mxu1  ;;  %v1053_v52 = vadd.f32 %v1602_v17, %v961_v48  ;;  %v1067_v17 = vld [vmem:[%s2055_s3] sm:$0xf] }
 0x44c   :  { %v2003_v19 = vpop.f32.mrb[10].mxu1  ;;  %v1045_v56 = vadd.f32 %v2001_v18, %v961_v48  ;;  %v1715_v18 = vld [vmem:[#allocation2 + $0x1b8] sm:$0xff]  }
 0x44d   :  { %v2005_v20 = vpop.f32.mrb[11].mxu1  ;;  %v1056_v59 = vadd.f32 %v2003_v19, %v961_v48  ;;  %1627 = vmatpush3.bf16.msra.mxu1 %v1715_v18  ;;  %v1716_v19 = vld [vmem:[#allocation2 + $0x1c0] sm:$0xff]  }
 0x44e   :  { %v1048_v62 = vadd.f32 %v2005_v20, %v961_v48  ;;  %v1717_v20 = vld [vmem:[#allocation2 + $0x1c8] sm:$0xff]  }
 0x4a2   :  { %v806_v21 = vpop.permute.xlu0 %805 }
 0x4a4   :  { %v808_v22 = vpop.permute.xlu1 %807 }
 0x4a7   :  { %v794_v23 = vpop.permute.xlu0 %793 }
 0x4a8   :  { %v800_v24 = vpop.permute.xlu1 %799  ;;  %v801_v26 = vadd.f32 %v794_v23, %v777_v25  ;;  %v1720_v23 = vld [vmem:[#allocation2 + $0x1e0] sm:$0xff]   ;;  %v1722_v25 = vld [vmem:[#allocation2 + $0x1f0] sm:$0xff]  }
 0x4a9   :  { %v804_v33 = vadd.f32 %v800_v24, %v773_v10  ;;  %v1721_v24 = vld [vmem:[#allocation2 + $0x1e8] sm:$0xff]  }
 0x4aa   :  { %v813_v32 = vadd.f32 %v806_v21, %v801_v26  ;;  %v1718_v21 = vld [vmem:[#allocation2 + $0x1d0] sm:$0xff]  }
 0x4ab   :  { %v798_v27 = vpop.permute.xlu0 %797 }
 0x4ac   :  { %v796_v28 = vpop.permute.xlu1 %795  ;;  %v803_v31 = vadd.f32 %v798_v27, %v779_v29 }
 0x4ad   :  { %v802_v30 = vadd.f32 %v796_v28, %v775_v15 }
 0x4af   :  { %v814_v34 = vadd.f32 %v808_v22, %v802_v30  ;;  %v810_v35 = vpop.permute.xlu0 %809  ;;  %v1719_v22 = vld [vmem:[#allocation2 + $0x1d8] sm:$0xff]  }
 0x4b0   :  { %v815_v36 = vadd.f32 %v810_v35, %v803_v31  ;;  %v812_v37 = vpop.permute.xlu1 %811  ;;  %v1723_v31 = vld [vmem:[#allocation2 + $0x1f8] sm:$0xff]  }
 0x4b1   :  { %v816_v38 = vadd.f32 %v812_v37, %v804_v33  ;;  %v817_v39 = vpack.c.bf16 %v814_v34, %v813_v32  ;;  %v1133_v32 = vsub.s32 6, %v1794_v1 }
 0x4b3   :  { %v818_v40 = vpack.c.bf16 %v816_v38, %v815_v36  ;;  %1580 = vmatprep.mubr.bf16.mxu0 %v817_v39  ;;  %v1134_v33 = vrot.slane %v1876_v9, %v1133_v32 }
 0x4b5   :  { %1581 = vmatmul.mubr.bf16.vlgmr.msra.gmra.mrb[8].mxu0 %v818_v40  ;;  %v1242_v40 = vsub.s32 7, %v1794_v1 }
 0x4b6   :  { %1608 = vmatprep.mubr.msk.bf16.mxu0 %vm1755_vm9, %v1754_v3 }
 0x588   :  { %v1582_v49 = vpop.f32.mrb[8].mxu0 }
 0x589   :  { %v930_v50 = vadd.f32 %v1582_v49, %v838_v47  ;;  %v921_v7 = vpop.f32.mrb[9].mxu0 }
 0x58a   :  { %v922_v8 = vadd.f32 %v921_v7, %v838_v47  ;;  %v1583_v51 = vpop.f32.mrb[10].mxu0 }
 0x58b   :  { %v938_v53 = vmax.f32 %v930_v50, 0.0  ;;  %v933_v54 = vadd.f32 %v1583_v51, %v838_v47  ;;  %v924_v55 = vpop.f32.mrb[11].mxu0 }
 0x58c   :  { %v936_v57 = vmax.f32 %v922_v8, 0.0  ;;  %v925_v58 = vadd.f32 %v924_v55, %v838_v47 }
 0x58d   :  { %v1061_v60 = vadd.f32 %v1053_v52, %v938_v53  ;;  %v939_v61 = vmax.f32 %v933_v54, 0.0 }
 0x58e   :  { %v1059_v63 = vadd.f32 %v1045_v56, %v936_v57  ;;  %v937_v0 = vmax.f32 %v925_v58, 0.0 }
 0x58f   :  { %v1062_v2 = vadd.f32 %v1056_v59, %v939_v61  ;;  %v1065_v11 = vmax.f32 %v1061_v60, 0.0 }
 0x590   :  { %v1060_v10 = vadd.f32 %v1048_v62, %v937_v0  ;;  %v1063_v13 = vmax.f32 %v1059_v63, 0.0 }
 0x591   :  { %v1066_v12 = vmax.f32 %v1062_v2, 0.0 }
 0x592   :  { %v1064_v14 = vmax.f32 %v1060_v10, 0.0 }
 0x593   :  { %v1069_v15 = vpack.c.bf16 %v1066_v12, %v1065_v11 }
 0x594   :  { %v1068_v16 = vpack.c.bf16 %v1064_v14, %v1063_v13 }
 0x596   :  { %1605 = vmatpush3.bf16.msra.mxu0 %v1068_v16 }
 0x597   :  { %1606 = vmatprep.subr.bf16.mxu0 %v1754_v3 }
 0x59a   :  { %1607 = vmatpush3.bf16.msra.mxu0 %v1069_v15 }
 0x59b   :  { %1632 = vmatprep.subr.bf16.mxu0 %v1754_v3 }
 0x59d   :  { %1609 = vmatmul.mubr.msk.bf16.vlgmr.msra.gmra.mrb[12].mxu0 %vm1070_vm10, %v1067_v17 }
 0x59e   :  { %1648 = vmatprep.mubr.msk.bf16.mxu0 %vm1755_vm9, %v1754_v3  ;;  %1633 = vmatpush3.bf16.msra.mxu0 %v1716_v19 }
 0x59f   :  { %1634 = vmatprep.subr.bf16.mxu0 %v1754_v3 }
 0x5a2   :  { %1635 = vmatpush3.bf16.msra.mxu0 %v1717_v20 }
 0x5a3   :  { %1636 = vmatprep.subr.bf16.mxu0 %v1754_v3 }
 0x5a6   :  { %1637 = vmatpush3.bf16.msra.mxu0 %v1718_v21 }
 0x5a7   :  { %1638 = vmatprep.subr.bf16.mxu0 %v1754_v3 }
 0x5aa   :  { %1639 = vmatpush3.bf16.msra.mxu0 %v1719_v22 }
 0x5ab   :  { %1640 = vmatprep.subr.bf16.mxu0 %v1754_v3 }
 0x5ae   :  { %1641 = vmatpush3.bf16.msra.mxu0 %v1720_v23 }
 0x5af   :  { %1642 = vmatprep.subr.bf16.mxu0 %v1754_v3 }
 0x5b2   :  { %1643 = vmatpush3.bf16.msra.mxu0 %v1721_v24 }
 0x5b3   :  { %1644 = vmatprep.subr.bf16.mxu0 %v1754_v3 }
 0x5b6   :  { %1645 = vmatpush3.bf16.msra.mxu0 %v1722_v25 }
 0x5b7   :  { %1646 = vmatprep.subr.bf16.mxu0 %v1754_v3  ;;  %v1243_v3 = vrot.slane %v1876_v9, %v1242_v40 }
 0x5ba   :  { %1647 = vmatpush3.bf16.msra.mxu0 %v1723_v31 }
 0x670   :  { %v1108_v26 = vpop.f32.mrb[12].mxu0 }
 0x671   :  { %v1114_v27 = vpack.c.bf16 %v1108_v26, %v1108_v26  ;;  %v1610_v28 = vpop.f32.mrb[13].mxu0 }
 0x672   :  { %v1111_v29 = vpop.f32.mrb[14].mxu0 }
 0x673   :  { %v1611_v30 = vpop.f32.mrb[15].mxu0  ;;  %1629 = vmatmul.mubr.bf16.vlgmr.msra.gmra.mrb[12].mxu1 %v1114_v27 }
 0x746   :  { %v1217_v34 = vpop.f32.mrb[12].mxu1 }
 0x747   :  { %v1218_v35 = vadd.f32 %v1217_v34, %v1134_v33  ;;  %v1630_v36 = vpop.f32.mrb[13].mxu1 }
 0x748   :  { %v1220_v37 = vpop.f32.mrb[14].mxu1 }
 0x749   :  { %v1223_v38 = vpack.c.bf16 %v1218_v35, %v1218_v35  ;;  %v1631_v39 = vpop.f32.mrb[15].mxu1 }
 0x74b   :  { %1649 = vmatmul.mubr.bf16.vlgmr.msra.gmra.mrb[16].mxu0 %v1223_v38 }
 0x81e   :  { %v1326_v4 = vpop.f32.mrb[16].mxu0 }
 0x81f   :  { %v1327_v41 = vadd.f32 %v1326_v4, %v1243_v3  ;;  %v1650_v43 = vpop.f32.mrb[17].mxu0 }
 0x820   :  { %v1329_v5 = vpop.f32.mrb[18].mxu0 }
 0x821   :  { %1332 = vst [vmem:[%s2056_s4] sm:$0xff] %v1327_v41  ;;  %v1651_v42 = vpop.f32.mrb[19].mxu0 }
 0x822   :  { %1337 = vsyncpa [#allocation3], 1 }

</bundles_post_ra>
